<compile_context>
chip_gen: v7x
topology: tpu7x:2x2x1
jax: 0.10.0
libtpu: 0.0.40
codegen_flags: <defaults>
</compile_context>

<pallas_src>
import functools

import jax
import jax.numpy as jnp
from jax.experimental import pallas as pl
from jax.experimental.pallas import tpu as pltpu


def _svm_hinge_kernel(b_ref, x_ref, w_ref, label_ref, out_ref, partial_ref, *,
                      batch):
    i = pl.program_id(0)
    t = x_ref.shape[0]          # rows per tile (multiple of 128)
    rt = t // 128               # sublane rows of the lane-dense slabs

    x = x_ref[...]              # (t, D) f32 tile of the batch (tail block may hold garbage)
    w = w_ref[...]              # (1, D) f32, resident
    bias = b_ref[0, 0]          # scalar (SMEM)
    label = label_ref[0]        # (rt, 128) f32, lane-dense

    # Linear layer on the VPU (sublane-broadcast multiply + lane reduce — no MXU
    # for an N=1 output), then one lane-dense relayout so everything downstream
    # is full-width.
    raw = jnp.sum(x * w, axis=-1, keepdims=True) + bias          # (t, 1)
    raw = raw.reshape(rt, 128)                                   # lane-dense (XLU relayout)

    # Hard decision in {-1, +1}  (raw == 0 -> -1, matching (raw > 0)*2 - 1).
    # Full-width lane-dense store; out-of-range rows are sliced off in the wrapper.
    out_ref[0] = jnp.where(raw > 0.0, 1.0, -1.0).astype(out_ref.dtype)

    # Hinge margins; jnp.where-mask rows past the true batch size so the garbage
    # in the (unpadded) x tail block never reaches the loss (select does not
    # propagate NaN/Inf).
    row = (i * t
           + 128 * jax.lax.broadcasted_iota(jnp.int32, (rt, 128), 0)
           + jax.lax.broadcasted_iota(jnp.int32, (rt, 128), 1))
    margins = jnp.maximum(0.0, 1.0 - label * raw)
    margins = jnp.where(row < batch, margins, 0.0)

    # Per-tile, per-lane partial sums only (sublane reduce).  The final scalar
    # reduce, the 0.5*||W||^2 regularizer and the C scaling happen in the
    # wrapper, which keeps every grid step independent (megacore-parallel safe).
    partial_ref[0] = jnp.sum(margins, axis=0, keepdims=True)     # (1, 128)


def svm_hinge_forward(x, W, b, label, C, *, block_rows=16384):
    """x: [B, D], W: [1, D], b: [1], label: [B], C: [1, 1].

    Returns (output [B, 1] in {-1, +1}, loss [1, 1]), both float32."""
    B, D = x.shape
    x = x.astype(jnp.float32)
    W2 = jnp.reshape(W, (1, D)).astype(jnp.float32)
    b2 = jnp.reshape(b, (1, 1)).astype(jnp.float32)
    c = jnp.reshape(C, ()).astype(jnp.float32)
    label1 = jnp.reshape(label, (B,)).astype(jnp.float32)

    # Row tile: multiple of 128 (lane-dense slabs), capped by a ~4 MiB-per-buffer
    # VMEM budget (double-buffered -> ~8 MiB for x, safe on v5e/v6e/v7x) and by B
    # so x blocks never exceed the unpadded array.
    vmem_cap_rows = max(128, ((4 * 1024 * 1024) // (4 * D)) // 128 * 128)
    t = max(128, min((block_rows // 128) * 128, vmem_cap_rows))
    if B >= 128:
        t = min(t, (B // 128) * 128)
    else:
        # Tiny batch: pad x up to a single 128-row tile (negligible HBM cost).
        x = jnp.pad(x, ((0, 128 - B), (0, 0)))
    n_tiles = pl.cdiv(B, t)
    rt = t // 128

    # Lane-dense label slab, padded to the full grid extent (cheap: B floats,
    # vs. the removed full extra pass over x).
    label_slab = jnp.pad(label1, (0, n_tiles * t - B)).reshape(n_tiles, rt, 128)

    kernel = functools.partial(_svm_hinge_kernel, batch=B)

    out_slab, partials = pl.pallas_call(
        kernel,
        grid=(n_tiles,),
        in_specs=[
            pl.BlockSpec(memory_space=pltpu.SMEM),              # b  (1,1) scalar
            pl.BlockSpec((t, D), lambda i: (i, 0)),             # x tile (streamed; tail masked)
            pl.BlockSpec((1, D), lambda i: (0, 0)),             # W (resident)
            pl.BlockSpec((1, rt, 128), lambda i: (i, 0, 0)),    # label tile (lane-dense)
        ],
        out_specs=[
            pl.BlockSpec((1, rt, 128), lambda i: (i, 0, 0)),    # sign tile (lane-dense)
            pl.BlockSpec((1, 1, 128), lambda i: (i, 0, 0)),     # per-tile per-lane hinge sums
        ],
        out_shape=[
            jax.ShapeDtypeStruct((n_tiles, rt, 128), jnp.float32),
            jax.ShapeDtypeStruct((n_tiles, 1, 128), jnp.float32),
        ],
        compiler_params=pltpu.CompilerParams(
            dimension_semantics=("parallel",),                  # independent tiles -> megacore
            vmem_limit_bytes=32 * 1024 * 1024),
    )(b2, x, W2, label_slab)

    out = out_slab.reshape(-1, 1)[:B]
    loss = (0.5 * jnp.sum(W2 * W2) + c * jnp.sum(partials)).reshape(1, 1)
    return out, loss


if __name__ == "__main__":
    key = jax.random.PRNGKey(0)
    k_x, k_w, k_b, k_l = jax.random.split(key, 4)

    batch = 300          # not a multiple of the tile -> exercises tail masking
    in_channels = 32

    x = jax.random.normal(k_x, (batch, in_channels), dtype=jnp.float32)
    W = jax.random.normal(k_w, (1, in_channels), dtype=jnp.float32)   # torch.randn(1, C)
    b = jax.random.uniform(k_b, (1,), dtype=jnp.float32)              # torch.rand(1)
    label = jnp.where(jax.random.bernoulli(k_l, 0.5, (batch,)), 1.0, -1.0).astype(jnp.float32)
    C = jnp.array([[0.5]], dtype=jnp.float32)

    # Plain-JAX reference.
    raw_ref = x @ W.T + b
    out_ref = (raw_ref > 0.0).astype(jnp.float32) * 2.0 - 1.0
    loss_ref = 0.5 * (W @ W.T) + C * jnp.maximum(
        0.0, 1.0 - label.reshape(batch, 1) * raw_ref).sum(0).reshape(1, 1)

    # Small tile -> 3-tile grid with a partially masked x tail block.
    out, loss = svm_hinge_forward(x, W, b, label, C, block_rows=128)
    jax.block_until_ready((out, loss))
    assert out.shape == (batch, 1)
    assert loss.shape == (1, 1)
    assert jnp.array_equal(out, out_ref)
    assert jnp.allclose(loss, loss_ref, rtol=1e-5, atol=1e-5)

    # Default (large) tile path.
    out2, loss2 = svm_hinge_forward(x, W, b, label, C)
    jax.block_until_ready((out2, loss2))
    assert jnp.array_equal(out2, out_ref)
    assert jnp.allclose(loss2, loss_ref, rtol=1e-5, atol=1e-5)

    print("KERNEL_OK")
</pallas_src>

<mosaic_0001>
module attributes {stable_mosaic.version = 11 : i64} {
  func.func @_svm_hinge_kernel(%arg0: i32, %arg1: memref<1x1xf32, #tpu.memory_space<smem>>, %arg2: memref<128x32xf32, #tpu.memory_space<vmem>>, %arg3: memref<1x32xf32, #tpu.memory_space<vmem>>, %arg4: memref<1x1x128xf32, #tpu.memory_space<vmem>>, %arg5: memref<1x1x128xf32, #tpu.memory_space<vmem>>, %arg6: memref<1x1x128xf32, #tpu.memory_space<vmem>>) attributes {dimension_semantics = [#tpu.dimension_semantics<parallel>], iteration_bounds = array<i64: 3>, scalar_prefetch = 0 : i64, scratch_operands = 0 : i64, tpu.core_type = #tpu.core_type<tc>, window_params = [{transform_indices = @transform_0, window_bounds = array<i64: 1, 1>}, {transform_indices = @transform_1, window_bounds = array<i64: 128, 32>}, {pipeline_mode = #tpu.pipeline_mode<synchronous>, transform_indices = @transform_2, window_bounds = array<i64: 1, 32>}, {transform_indices = @transform_3, window_bounds = array<i64: 1, 1, 128>}, {transform_indices = @transform_4, window_bounds = array<i64: 1, 1, 128>}, {transform_indices = @transform_5, window_bounds = array<i64: 1, 1, 128>}]} {
    %c0 = arith.constant 0 : index
    %c0_0 = arith.constant 0 : index
    %0 = vector.load %arg2[%c0, %c0_0] : memref<128x32xf32, #tpu.memory_space<vmem>>, vector<128x32xf32>
    %c0_1 = arith.constant 0 : index
    %c0_2 = arith.constant 0 : index
    %1 = vector.load %arg3[%c0_1, %c0_2] : memref<1x32xf32, #tpu.memory_space<vmem>>, vector<1x32xf32>
    %c0_3 = arith.constant 0 : index
    %c0_4 = arith.constant 0 : index
    %2 = memref.load %arg1[%c0_3, %c0_4] : memref<1x1xf32, #tpu.memory_space<smem>>
    %c0_5 = arith.constant 0 : index
    %c0_6 = arith.constant 0 : index
    %c0_7 = arith.constant 0 : index
    %3 = vector.load %arg4[%c0_5, %c0_6, %c0_7] : memref<1x1x128xf32, #tpu.memory_space<vmem>>, vector<1x1x128xf32>
    %4 = vector.shape_cast %3 : vector<1x1x128xf32> to vector<1x128xf32>
    %5 = vector.broadcast %1 : vector<1x32xf32> to vector<128x32xf32>
    %6 = arith.mulf %0, %5 : vector<128x32xf32>
    %cst = arith.constant dense<0.000000e+00> : vector<128xf32>
    %7 = vector.multi_reduction <add>, %6, %cst [1] : vector<128x32xf32> to vector<128xf32>
    %8 = vector.shape_cast %7 : vector<128xf32> to vector<128x1xf32>
    %9 = vector.broadcast %2 : f32 to vector<128x1xf32>
    %10 = arith.addf %8, %9 : vector<128x1xf32>
    %11 = vector.shape_cast %10 : vector<128x1xf32> to vector<1x128xf32>
    %cst_8 = arith.constant 0.000000e+00 : f32
    %12 = vector.broadcast %cst_8 : f32 to vector<1x128xf32>
    %13 = arith.cmpf ogt, %11, %12 : vector<1x128xf32>
    %cst_9 = arith.constant 1.000000e+00 : f32
    %cst_10 = arith.constant -1.000000e+00 : f32
    %14 = vector.broadcast %cst_9 : f32 to vector<1x128xf32>
    %15 = vector.broadcast %cst_10 : f32 to vector<1x128xf32>
    %16 = arith.select %13, %14, %15 : vector<1x128xi1>, vector<1x128xf32>
    %c0_11 = arith.constant 0 : index
    %c0_12 = arith.constant 0 : index
    %c0_13 = arith.constant 0 : index
    %17 = vector.load %arg5[%c0_11, %c0_12, %c0_13] : memref<1x1x128xf32, #tpu.memory_space<vmem>>, vector<1x1x128xf32>
    %18 = vector.shape_cast %17 : vector<1x1x128xf32> to vector<1x128xf32>
    %19 = vector.shape_cast %16 : vector<1x128xf32> to vector<1x1x128xf32>
    tpu.vector_store %arg5[%c0_11, %c0_12, %c0_13], %19 {strides = array<i32>} : memref<1x1x128xf32, #tpu.memory_space<vmem>>, vector<1x1x128xf32>,
    %c128_i32 = arith.constant 128 : i32
    %20 = arith.muli %arg0, %c128_i32 : i32
    %21 = tpu.iota {dimensions = array<i32: 0>} : vector<1x128xi32>
    %c128_i32_14 = arith.constant 128 : i32
    %22 = vector.broadcast %c128_i32_14 : i32 to vector<1x128xi32>
    %23 = arith.muli %22, %21 : vector<1x128xi32>
    %24 = vector.broadcast %20 : i32 to vector<1x128xi32>
    %25 = arith.addi %24, %23 : vector<1x128xi32>
    %26 = tpu.iota {dimensions = array<i32: 1>} : vector<1x128xi32>
    %27 = arith.addi %25, %26 : vector<1x128xi32>
    %28 = arith.mulf %4, %11 : vector<1x128xf32>
    %cst_15 = arith.constant 1.000000e+00 : f32
    %29 = vector.broadcast %cst_15 : f32 to vector<1x128xf32>
    %30 = arith.subf %29, %28 : vector<1x128xf32>
    %cst_16 = arith.constant 0.000000e+00 : f32
    %31 = vector.broadcast %cst_16 : f32 to vector<1x128xf32>
    %32 = arith.maximumf %31, %30 : vector<1x128xf32>
    %c300_i32 = arith.constant 300 : i32
    %33 = vector.broadcast %c300_i32 : i32 to vector<1x128xi32>
    %34 = arith.cmpi slt, %27, %33 : vector<1x128xi32>
    %cst_17 = arith.constant 0.000000e+00 : f32
    %35 = vector.broadcast %cst_17 : f32 to vector<1x128xf32>
    %36 = arith.select %34, %32, %35 : vector<1x128xi1>, vector<1x128xf32>
    %cst_18 = arith.constant dense<0.000000e+00> : vector<128xf32>
    %37 = vector.multi_reduction <add>, %36, %cst_18 [0] : vector<1x128xf32> to vector<128xf32>
    %38 = vector.shape_cast %37 : vector<128xf32> to vector<1x128xf32>
    %c0_19 = arith.constant 0 : index
    %c0_20 = arith.constant 0 : index
    %c0_21 = arith.constant 0 : index
    %39 = vector.load %arg6[%c0_19, %c0_20, %c0_21] : memref<1x1x128xf32, #tpu.memory_space<vmem>>, vector<1x1x128xf32>
    %40 = vector.shape_cast %39 : vector<1x1x128xf32> to vector<1x128xf32>
    %41 = vector.shape_cast %38 : vector<1x128xf32> to vector<1x1x128xf32>
    tpu.vector_store %arg6[%c0_19, %c0_20, %c0_21], %41 {strides = array<i32>} : memref<1x1x128xf32, #tpu.memory_space<vmem>>, vector<1x1x128xf32>,
    return
  }
  func.func @transform_0(%arg0: i32) -> (i32, i32) {
    %c0_i32 = arith.constant 0 : i32
    %c0_i32_0 = arith.constant 0 : i32
    %c0_i32_1 = arith.constant 0 : i32
    return %c0_i32, %c0_i32_0 : i32, i32
  }
  func.func @transform_1(%arg0: i32) -> (i32, i32) {
    %c0_i32 = arith.constant 0 : i32
    %c0_i32_0 = arith.constant 0 : i32
    return %arg0, %c0_i32 : i32, i32
  }
  func.func @transform_2(%arg0: i32) -> (i32, i32) {
    %c0_i32 = arith.constant 0 : i32
    %c0_i32_0 = arith.constant 0 : i32
    %c0_i32_1 = arith.constant 0 : i32
    return %c0_i32, %c0_i32_0 : i32, i32
  }
  func.func @transform_3(%arg0: i32) -> (i32, i32, i32) {
    %c0_i32 = arith.constant 0 : i32
    %c0_i32_0 = arith.constant 0 : i32
    %c0_i32_1 = arith.constant 0 : i32
    return %arg0, %c0_i32, %c0_i32_0 : i32, i32, i32
  }
  func.func @transform_4(%arg0: i32) -> (i32, i32, i32) {
    %c0_i32 = arith.constant 0 : i32
    %c0_i32_0 = arith.constant 0 : i32
    %c0_i32_1 = arith.constant 0 : i32
    return %arg0, %c0_i32, %c0_i32_0 : i32, i32, i32
  }
  func.func @transform_5(%arg0: i32) -> (i32, i32, i32) {
    %c0_i32 = arith.constant 0 : i32
    %c0_i32_0 = arith.constant 0 : i32
    %c0_i32_1 = arith.constant 0 : i32
    return %arg0, %c0_i32, %c0_i32_0 : i32, i32, i32
  }
}

</mosaic_0001>

<bundles_post_ra>
// kernel: tpu_custom_call.1
= control target key start
LH: loop header
LB: loop body
LE: loop exit
PB: predicated region body
PF: predicated region fallthrough
CT: control target
= control target key end

     0   :  { %s3107_s0 = inlined_call_operand.<no memory space> [shape: f32[1,1], index: 0, kind: input, shape index: {}]   ;;  %s3108_s1 = inlined_call_operand.vmem [shape: f32[300,32], index: 1, kind: input, shape index: {}]   ;;  %s3109_s2 = inlined_call_operand.vmem [shape: f32[1,32], index: 2, kind: input, shape index: {}]   ;;  %s3110_s3 = inlined_call_operand.vmem [shape: f32[3,1,128], index: 3, kind: input, shape index: {}]   ;;  %s3111_s4 = inlined_call_operand.hbm [shape: f32[3,1,128], index: 4, kind: output, shape index: {0}]   ;;  %s3112_s5 = inlined_call_operand.hbm [shape: f32[3,1,128], index: 5, kind: output, shape index: {1}]  }
   0x1   :  { %11 = sst [smem:[#allocation2]] %s3107_s0 }
   0x2   :  { %12 = vsyncpa [#allocation4], 0 }
   0x3   :  { %14 = vsyncpa [#allocation4 + $0x1], 0 }
   0x4   :  { %15 = vsyncpa [#allocation6], 0 }
   0x5   :  { %17 = vsyncpa [#allocation6 + $0x1], 0  ;;  %s2322_s20 = smov 0   ;;  %s2324_s21 = smov 0  }
   0x6   :  { %s2326_s22 = smov 0   ;;  %s2328_s23 = smov 0  }
   0x7 LB: > { %s2343_s0 = sadd.s32 4294967295, %s2282_s23   ;;  %s2127_s24 = sadd.s32 4294967294, %s2282_s23   ;;  %s2282_s23 = sphi %s2328_s23, %s3123_s23   ;;  %s2278_s22 = sphi %s2326_s22, %s3122_s22   ;;  %s2274_s21 = sphi %s2324_s21, %s3121_s21   ;;  %s2270_s20 = sphi %s2322_s20, %s3120_s20  }
   0x8   : > { %s2347_s25 = sadd.s32 1, %s2282_s23   ;;  %s124_s26 = sadd.s32 1, %s2278_s22 }
   0x9   : > { %s121_s27 = ssub.s32 %s2282_s23, %s2347_s25  ;;  %p134_p0 = scmp.ne.s32.totalorder %s2278_s22, %s2274_s21 }
   0xa   : > { %p122_p1 = scmp.eq.s32.totalorder %s121_s27, 0  ;;  %p135_p2 = scmp.eq.s32.totalorder %s2343_s0, 2 }
   0xb   : > { %p140_p3 = scmp.ne.s32.totalorder %s2274_s21, %s2270_s20  ;;  %p141_p4 = scmp.eq.s32.totalorder %s2127_s24, 2 }
   0xc   : > { %s2358_s28 = scalar_select %p122_p1, %s2278_s22, %s124_s26  }
   0xd   : > { %p2360_p5 = por %p135_p2, %p134_p0  ;;  %p2364_p6 = por %p141_p4, %p140_p3 }
   0xe   : > { %p2130_p7 = scmp.ge.s32.totalorder %s2282_s23, 1  ;;  %p214_p8 = scmp.lt.s32.totalorder %s2282_s23, 4 }
  0x10   : > { %p215_p9 = pnand %p2130_p7, %p214_p8 }
  0x12   : > { %218 = sbr.rel (%p215_p9) target bundleno = 432 (0x1b0), region = 36 }
  0x19   : > { %s2371_s6 = sshll.u32 %s2343_s0, 4  ;;  %v2133_v0 = vld [vmem:[%s3109_s2] ss:$0 sm:$0xff]  ;;  %vm310_vm0 = vcmask 261120   ;;  %v2284_v49 = vmov 0   ;;  %s286_s14 = sld [smem:[#allocation2]]  ;;  %v424_v50 = vlaneseq }
  0x1a   : > { %p257_p10 = scmp.lt.s32.totalorder %s2371_s6, 37  ;;  %2186 = vset.pattern.permute.xlu0 %v2284_v49  ;;  %2187 = vset.pattern.permute.xlu1 %v2284_v49  ;;  %v2285_v52 = vmov 1966171168   ;;  %vm435_vm1 = vcmask 130112   ;;  %vm442_vm2 = vcmask 195712   ;;  %vm449_vm3 = vcmask 261312   ;;  %s2991_s24 = scalar_lea.hbm %s3111_s4, %s2371_s6 }
  0x1b   : > { %v2415_v51 = vshrl.u32 %v424_v50, 7  ;;  %v1077_v53 = vunpack.c.l.s4 %v2285_v52  ;;  %v2428_v58 = vand.u32 127, %v424_v50  ;;  %vm3114_vm4 = vcmask 326912   ;;  %s2971_s15 = sand.u32 1, %s2274_s21  }
  0x1c   : > { %s258_s7 = scalar_select %p257_p10, %s2371_s6, 37  ;;  %vm463_vm8 = vcmask 392512   ;;  %vm470_vm9 = vcmask 458112   ;;  %vm477_vm12 = vcmask 523712   ;;  %vm484_vm14 = vcmask 589312  }
  0x1d   : > { %v2420_v55 = vsub.s32 0, %v2415_v51  ;;  %v2423_v56 = vsub.s32 1, %v2415_v51  ;;  %v2426_v57 = vsub.s32 2, %v2415_v51  ;;  %v2431_v59 = vsub.s32 3, %v2415_v51  ;;  %s245_s16 = scalar_lea.vmem [#allocation3], %s2971_s15  ;;  %s2006_s26 = scalar_lea.sflag [#allocation4], %s2971_s15 }
  0x1e   : > { %s2132_s8 = sshll.u32 %s258_s7, 3  ;;  %v2434_v60 = vsub.s32 4, %v2415_v51  ;;  %v2437_v61 = vsub.s32 5, %v2415_v51  ;;  %v1078_v62 = vunpack.c.0.s8 %v1077_v53  ;;  %v430_v63 = vadd.s32 4294967288, %v2428_v58  ;;  %s2022_s17 = sshll.u32 %s245_s16, 4  ;;  %s2993_s17 = int_to_ptr.vmem [resolvable:$true] %s2022_s17 }
  0x1f   : > { %s2381_s13 = scalar_lea.vmem %s3108_s1, %s2132_s8  ;;  %v2417_v54 = vstv %s286_s14  ;;  %vm491_vm15 = vcmask 654912   ;;  %s2188_s27 = scalar_lea.vmem %s2993_s17, 16 }
  0x20   : > { %v269_v1 = vld [vmem:[%s2381_s13] sm:$0xff]  ;;  %v271_v2 = vld [vmem:[%s2381_s13 + $0x10] sm:$0xff]  ;;  %v270_v3 = vld [vmem:[%s2381_s13 + $0x8] sm:$0xff]  ;;  %p2189_p11 = scmp.ne.s32.totalorder %s2993_s17, %s2188_s27  ;;  %s2287_s7 = smov [#allocation3]  }
  0x21   : > { %v294_v4 = vmul.f32 %v2133_v0, %v269_v1  ;;  %v296_v5 = vmul.f32 %v2133_v0, %v271_v2  ;;  %v295_v6 = vmul.f32 %v2133_v0, %v270_v3  ;;  %v272_v7 = vld [vmem:[%s2381_s13 + $0x18] sm:$0xff]  ;;  %v273_v9 = vld [vmem:[%s2381_s13 + $0x20] sm:$0xff]  ;;  %v274_v10 = vld [vmem:[%s2381_s13 + $0x28] sm:$0xff]  ;;  %v444_v1 = vadd.s32 4294967272, %v2428_v58  ;;  %s2192_s8 = sshll.u32 %s2287_s7, 4  ;;  %s2193_s8 = int_to_ptr.vmem [resolvable:$false] %s2192_s8 }
  0x22   : > { %v297_v8 = vmul.f32 %v2133_v0, %v272_v7  ;;  %v298_v15 = vmul.f32 %v2133_v0, %v273_v9  ;;  %v299_v16 = vmul.f32 %v2133_v0, %v274_v10  ;;  %v275_v17 = vld [vmem:[%s2381_s13 + $0x30] sm:$0xff]  ;;  %v276_v18 = vld [vmem:[%s2381_s13 + $0x38] sm:$0xff]  ;;  %v277_v23 = vld [vmem:[%s2381_s13 + $0x40] sm:$0xff]  ;;  %v451_v2 = vadd.s32 4294967264, %v2428_v58  ;;  %p2190_p12 = pnand %p2189_p11, %p2360_p5  ;;  %s2194_s9 = scalar_lea.vmem %s2193_s8, 32 }
  0x23   : > { %v311_v11 = vsel %vm310_vm0, %v294_v4, 0.0  ;;  %v317_v12 = vsel %vm310_vm0, %v296_v5, 0.0  ;;  %v314_v13 = vsel %vm310_vm0, %v295_v6, 0.0  ;;  %v300_v21 = vmul.f32 %v2133_v0, %v275_v17  ;;  %v278_v24 = vld [vmem:[%s2381_s13 + $0x48] sm:$0xff]  ;;  %v279_v29 = vld [vmem:[%s2381_s13 + $0x50] sm:$0xff]  ;;  %v280_v30 = vld [vmem:[%s2381_s13 + $0x58] sm:$0xff]  ;;  %p2195_p0 = scmp.lt.s32.totalorder %s2993_s17, %s2193_s8  ;;  %p2196_p1 = scmp.lt.s32.totalorder %s2194_s9, %s2188_s27 }
  0x24   : > { %312 = vadd.xlane.f32.xlu0 %v311_v11  ;;  %318 = vadd.xlane.f32.xlu1 %v317_v12  ;;  %v320_v14 = vsel %vm310_vm0, %v297_v8, 0.0  ;;  %v323_v19 = vsel %vm310_vm0, %v298_v15, 0.0  ;;  %v326_v20 = vsel %vm310_vm0, %v299_v16, 0.0  ;;  %v301_v22 = vmul.f32 %v2133_v0, %v276_v18  ;;  %v281_v35 = vld [vmem:[%s2381_s13 + $0x60] sm:$0xff]  ;;  %v282_v36 = vld [vmem:[%s2381_s13 + $0x68] sm:$0xff]  ;;  %v283_v41 = vld [vmem:[%s2381_s13 + $0x70] sm:$0xff]  ;;  %p2191_p13 = pneg %p2190_p12 }
  0x25   : > { %v329_v25 = vsel %vm310_vm0, %v300_v21, 0.0  ;;  %v302_v27 = vmul.f32 %v2133_v0, %v277_v23  ;;  %v303_v28 = vmul.f32 %v2133_v0, %v278_v24  ;;  %v304_v33 = vmul.f32 %v2133_v0, %v279_v29  ;;  %v284_v42 = vld [vmem:[%s2381_s13 + $0x78] sm:$0xff]  ;;  %p2197_p2 = por %p2196_p1, %p2195_p0 }
  0x26   : > { %v332_v26 = vsel %vm310_vm0, %v301_v22, 0.0  ;;  %v305_v34 = vmul.f32 %v2133_v0, %v280_v30  ;;  %v306_v39 = vmul.f32 %v2133_v0, %v281_v35  ;;  %v307_v40 = vmul.f32 %v2133_v0, %v282_v36 }
  0x27   : > { %v335_v31 = vsel %vm310_vm0, %v302_v27, 0.0  ;;  %v338_v32 = vsel %vm310_vm0, %v303_v28, 0.0  ;;  %v341_v37 = vsel %vm310_vm0, %v304_v33, 0.0  ;;  %v308_v45 = vmul.f32 %v2133_v0, %v283_v41  ;;  %p2198_p3 = pnand %p2197_p2, %p2191_p13 }
  0x28   : > { %315 = vadd.xlane.f32.xlu0 %v314_v13  ;;  %321 = vadd.xlane.f32.xlu1 %v320_v14  ;;  %v344_v38 = vsel %vm310_vm0, %v305_v34, 0.0  ;;  %v347_v43 = vsel %vm310_vm0, %v306_v39, 0.0  ;;  %v350_v44 = vsel %vm310_vm0, %v307_v40, 0.0  ;;  %v309_v46 = vmul.f32 %v2133_v0, %v284_v42 }
  0x29   : > { %v353_v47 = vsel %vm310_vm0, %v308_v45, 0.0  ;;  %v437_v0 = vadd.s32 4294967280, %v2428_v58  ;;  %v458_v3 = vadd.s32 4294967256, %v2428_v58  ;;  %v465_v4 = vadd.s32 4294967248, %v2428_v58 }
  0x2a   : > { %v356_v48 = vsel %vm310_vm0, %v309_v46, 0.0  ;;  %v472_v5 = vadd.s32 4294967240, %v2428_v58  ;;  %v479_v6 = vadd.s32 4294967232, %v2428_v58  ;;  %v2448_v7 = vsub.s32 6, %v2415_v51 }
  0x2b   : > { %v486_v8 = vadd.s32 4294967224, %v2428_v58  ;;  %v500_v9 = vadd.s32 4294967208, %v2428_v58  ;;  %v493_v10 = vadd.s32 4294967216, %v2428_v58  ;;  %v2454_v11 = vsub.s32 7, %v2415_v51 }
  0x2c   : > { %324 = vadd.xlane.f32.xlu0 %v323_v19  ;;  %327 = vadd.xlane.f32.xlu1 %v326_v20  ;;  %v2457_v12 = vsub.s32 %v1078_v62, %v2415_v51  ;;  %v2461_v13 = vsub.s32 %v2428_v58, %v2415_v51  ;;  %v2464_v14 = vsub.s32 %v430_v63, %v2415_v51  ;;  %v2503_v29 = vadd.s32 4294967192, %v2428_v58 }
  0x2d   : > { %v2467_v15 = vsub.s32 %v437_v0, %v2415_v51  ;;  %v2470_v16 = vsub.s32 %v444_v1, %v2415_v51  ;;  %v2473_v17 = vsub.s32 %v451_v2, %v2415_v51  ;;  %v2476_v20 = vsub.s32 %v458_v3, %v2415_v51 }
  0x2e   : > { %v2479_v21 = vsub.s32 %v465_v4, %v2415_v51  ;;  %v2482_v22 = vsub.s32 %v472_v5, %v2415_v51  ;;  %v2485_v23 = vsub.s32 %v479_v6, %v2415_v51  ;;  %v2497_v27 = vsub.s32 %v493_v10, %v2415_v51 }
  0x2f   : > { %v2506_v30 = vadd.s32 4294967200, %v2428_v58 }
  0x30   : > { %330 = vadd.xlane.f32.xlu0 %v329_v25  ;;  %333 = vadd.xlane.f32.xlu1 %v332_v26  ;;  %v2491_v25 = vsub.s32 %v486_v8, %v2415_v51  ;;  %v2494_v26 = vsub.s32 %v500_v9, %v2415_v51 }
  0x32   : > { %3117 = vst [vmem:[#allocation9_spill] sm:$0xff] %v2494_v26 }
  0x34   : > { %336 = vadd.xlane.f32.xlu0 %v335_v31  ;;  %339 = vadd.xlane.f32.xlu1 %v338_v32  ;;  %v2509_v31 = vadd.s32 4294967184, %v2428_v58 }
  0x38   : > { %342 = vadd.xlane.f32.xlu0 %v341_v37  ;;  %345 = vadd.xlane.f32.xlu1 %v344_v38 }
  0x3c   : > { %348 = vadd.xlane.f32.xlu0 %v347_v43  ;;  %351 = vadd.xlane.f32.xlu1 %v350_v44 }
  0x40   : > { %354 = vadd.xlane.f32.xlu0 %v353_v47  ;;  %357 = vadd.xlane.f32.xlu1 %v356_v48 }
  0xb1   : > { %v313_v18 = vpop.xlane.xlu0 %312  ;;  %v319_v19 = vpop.xlane.xlu1 %318 }
  0xb2   : > { %v2488_v24 = vadd.f32 %v2417_v54, %v313_v18  ;;  %v2500_v28 = vadd.f32 %v2417_v54, %v319_v19 }
  0xb4   : > { %v563_v32 = vrot.slane %v2488_v24, %v2420_v55  ;;  %v567_v33 = vrot.slane %v2488_v24, %v2423_v56  ;;  %v571_v34 = vrot.slane %v2488_v24, %v2426_v57  ;;  %v575_v35 = vrot.slane %v2488_v24, %v2431_v59 }
  0xb5   : > { %v316_v36 = vpop.xlane.xlu0 %315  ;;  %v322_v37 = vpop.xlane.xlu1 %321  ;;  %v579_v38 = vrot.slane %v2488_v24, %v2434_v60  ;;  %v583_v39 = vrot.slane %v2488_v24, %v2437_v61  ;;  %v587_v40 = vrot.slane %v2488_v24, %v2448_v7  ;;  %v591_v41 = vrot.slane %v2488_v24, %v2454_v11 }
  0xb6   : > { %v2528_v42 = vadd.f32 %v2417_v54, %v316_v36  ;;  %v2531_v43 = vadd.f32 %v2417_v54, %v322_v37  ;;  %v1072_v44 = vcombine.low %v563_v32, %v567_v33  ;;  %v1073_v45 = vcombine.low %v571_v34, %v575_v35 }
  0xb7   : > { %v1074_v46 = vcombine.low %v579_v38, %v583_v39  ;;  %v1075_v47 = vcombine.low %v587_v40, %v591_v41  ;;  %v627_v48 = vrot.slane %v2500_v28, %v2420_v55  ;;  %v631_v49 = vrot.slane %v2500_v28, %v2423_v56 }
  0xb8   : > { %v1082_v50 = vrot.slane %v1072_v44, %v2457_v12  ;;  %v1089_v52 = vrot.slane %v1073_v45, %v2457_v12  ;;  %v595_v53 = vrot.slane %v2528_v42, %v2420_v55  ;;  %v599_v62 = vrot.slane %v2528_v42, %v2423_v56 }
  0xb9   : > { %v325_v63 = vpop.xlane.xlu0 %324  ;;  %v328_v0 = vpop.xlane.xlu1 %327  ;;  %v1096_v1 = vrot.slane %v1074_v46, %v2457_v12  ;;  %v1103_v2 = vrot.slane %v1075_v47, %v2457_v12  ;;  %v603_v3 = vrot.slane %v2528_v42, %v2426_v57  ;;  %v607_v4 = vrot.slane %v2528_v42, %v2431_v59 }
  0xba   : > { %v2550_v5 = vadd.f32 %v2417_v54, %v325_v63  ;;  %v2553_v6 = vadd.f32 %v2417_v54, %v328_v0  ;;  %v1104_v8 = vcombine.low %v1082_v50, %v1089_v52  ;;  %v611_v9 = vrot.slane %v2528_v42, %v2434_v60 }
  0xbb   : > { %v1105_v10 = vcombine.low %v1096_v1, %v1103_v2  ;;  %v615_v18 = vrot.slane %v2528_v42, %v2437_v61  ;;  %v619_v19 = vrot.slane %v2528_v42, %v2448_v7  ;;  %v623_v32 = vrot.slane %v2528_v42, %v2454_v11 }
  0xbc   : > { %v1112_v33 = vrot.slane %v1104_v8, %v2457_v12  ;;  %v1121_v34 = vcombine.low %v595_v53, %v599_v62  ;;  %v1122_v35 = vcombine.low %v603_v3, %v607_v4  ;;  %v635_v36 = vrot.slane %v2500_v28, %v2426_v57 }
  0xbd   : > { %v331_v37 = vpop.xlane.xlu0 %330  ;;  %v334_v38 = vpop.xlane.xlu1 %333  ;;  %v1119_v39 = vrot.slane %v1105_v10, %v2457_v12  ;;  %v1123_v40 = vcombine.low %v611_v9, %v615_v18  ;;  %v1124_v41 = vcombine.low %v619_v19, %v623_v32  ;;  %v639_v44 = vrot.slane %v2500_v28, %v2431_v59 }
  0xbe   : > { %v2570_v45 = vadd.f32 %v2417_v54, %v331_v37  ;;  %v2573_v46 = vadd.f32 %v2417_v54, %v334_v38  ;;  %v1131_v47 = vrot.slane %v1121_v34, %v2457_v12  ;;  %v1138_v50 = vrot.slane %v1122_v35, %v2457_v12 }
  0xbf   : > { %v1120_v52 = vcombine.low %v1112_v33, %v1119_v39  ;;  %v1145_v53 = vrot.slane %v1123_v40, %v2457_v12  ;;  %v1152_v62 = vrot.slane %v1124_v41, %v2457_v12  ;;  %v643_v63 = vrot.slane %v2500_v28, %v2434_v60 }
  0xc0   : > { %v1153_v0 = vcombine.low %v1131_v47, %v1138_v50  ;;  %v647_v1 = vrot.slane %v2500_v28, %v2437_v61  ;;  %v651_v2 = vrot.slane %v2500_v28, %v2448_v7  ;;  %v655_v3 = vrot.slane %v2500_v28, %v2454_v11 }
  0xc1   : > { %1857 = vperm.xlu0 %2186, %v1120_v52   ;;  %v337_v4 = vpop.xlane.xlu0 %336  ;;  %v340_v8 = vpop.xlane.xlu1 %339  ;;  %v1154_v9 = vcombine.low %v1145_v53, %v1152_v62  ;;  %v1170_v10 = vcombine.low %v627_v48, %v631_v49  ;;  %v1171_v18 = vcombine.low %v635_v36, %v639_v44  ;;  %v659_v19 = vrot.slane %v2531_v43, %v2420_v55 }
  0xc2   : > { %v2590_v32 = vadd.f32 %v2417_v54, %v337_v4  ;;  %v2593_v33 = vadd.f32 %v2417_v54, %v340_v8  ;;  %v1161_v34 = vrot.slane %v1153_v0, %v2457_v12  ;;  %v1172_v35 = vcombine.low %v643_v63, %v647_v1 }
  0xc3   : > { %v1168_v37 = vrot.slane %v1154_v9, %v2457_v12  ;;  %v1173_v38 = vcombine.low %v651_v2, %v655_v3  ;;  %v1180_v39 = vrot.slane %v1170_v10, %v2457_v12  ;;  %v1187_v48 = vrot.slane %v1171_v18, %v2457_v12 }
  0xc4   : > { %v1194_v49 = vrot.slane %v1172_v35, %v2457_v12  ;;  %v663_v36 = vrot.slane %v2531_v43, %v2423_v56  ;;  %v667_v40 = vrot.slane %v2531_v43, %v2426_v57  ;;  %v671_v41 = vrot.slane %v2531_v43, %v2431_v59 }
  0xc5   : > { %v1169_v44 = vcombine.low %v1161_v34, %v1168_v37  ;;  %v343_v47 = vpop.xlane.xlu0 %342  ;;  %v346_v50 = vpop.xlane.xlu1 %345  ;;  %v1201_v52 = vrot.slane %v1173_v38, %v2457_v12  ;;  %v1202_v53 = vcombine.low %v1180_v39, %v1187_v48  ;;  %v675_v62 = vrot.slane %v2531_v43, %v2434_v60 }
  0xc6   : > { %v2610_v63 = vadd.f32 %v2417_v54, %v343_v47  ;;  %v2613_v0 = vadd.f32 %v2417_v54, %v346_v50  ;;  %v679_v1 = vrot.slane %v2531_v43, %v2437_v61  ;;  %v683_v2 = vrot.slane %v2531_v43, %v2448_v7 }
  0xc7   : > { %1860 = vperm.xlu1 %2187, %v1169_v44   ;;  %v1203_v3 = vcombine.low %v1194_v49, %v1201_v52  ;;  %v1210_v4 = vrot.slane %v1202_v53, %v2457_v12  ;;  %v687_v8 = vrot.slane %v2531_v43, %v2454_v11  ;;  %v1219_v9 = vcombine.low %v659_v19, %v663_v36 }
  0xc8   : > { %v1220_v10 = vcombine.low %v667_v40, %v671_v41  ;;  %v1221_v18 = vcombine.low %v675_v62, %v679_v1  ;;  %v691_v34 = vrot.slane %v2550_v5, %v2420_v55  ;;  %v695_v35 = vrot.slane %v2550_v5, %v2423_v56 }
  0xc9   : > { %v1217_v37 = vrot.slane %v1203_v3, %v2457_v12  ;;  %v349_v38 = vpop.xlane.xlu0 %348  ;;  %v352_v39 = vpop.xlane.xlu1 %351  ;;  %v1222_v48 = vcombine.low %v683_v2, %v687_v8  ;;  %v1229_v49 = vrot.slane %v1219_v9, %v2457_v12  ;;  %v699_v44 = vrot.slane %v2550_v5, %v2426_v57 }
  0xca   : > { %v2631_v19 = vadd.f32 %v2417_v54, %v349_v38  ;;  %v2634_v36 = vadd.f32 %v2417_v54, %v352_v39  ;;  %v1236_v40 = vrot.slane %v1220_v10, %v2457_v12  ;;  %v1243_v41 = vrot.slane %v1221_v18, %v2457_v12 }
  0xcb   : > { %v1218_v47 = vcombine.low %v1210_v4, %v1217_v37  ;;  %v1250_v50 = vrot.slane %v1222_v48, %v2457_v12  ;;  %v703_v52 = vrot.slane %v2550_v5, %v2431_v59  ;;  %v707_v53 = vrot.slane %v2550_v5, %v2434_v60 }
  0xcc   : > { %v1251_v62 = vcombine.low %v1229_v49, %v1236_v40  ;;  %v711_v1 = vrot.slane %v2550_v5, %v2437_v61  ;;  %v715_v2 = vrot.slane %v2550_v5, %v2448_v7  ;;  %v719_v3 = vrot.slane %v2550_v5, %v2454_v11 }
  0xcd   : > { %1863 = vperm.xlu1 %2187, %v1218_v47   ;;  %v1252_v4 = vcombine.low %v1243_v41, %v1250_v50  ;;  %v355_v8 = vpop.xlane.xlu0 %354  ;;  %v358_v9 = vpop.xlane.xlu1 %357  ;;  %v1268_v10 = vcombine.low %v691_v34, %v695_v35  ;;  %v1269_v18 = vcombine.low %v699_v44, %v703_v52  ;;  %v851_v37 = vrot.slane %v2593_v33, %v2420_v55 }
  0xce   : > { %v1259_v38 = vrot.slane %v1251_v62, %v2457_v12  ;;  %v2653_v39 = vadd.f32 %v2417_v54, %v355_v8  ;;  %v2656_v48 = vadd.f32 %v2417_v54, %v358_v9  ;;  %v1270_v49 = vcombine.low %v707_v53, %v711_v1 }
  0xcf   : > { %v1266_v40 = vrot.slane %v1252_v4, %v2457_v12  ;;  %v1271_v47 = vcombine.low %v715_v2, %v719_v3  ;;  %v1278_v41 = vrot.slane %v1268_v10, %v2457_v12  ;;  %v1285_v34 = vrot.slane %v1269_v18, %v2457_v12 }
  0xd0   : > { %v1292_v35 = vrot.slane %v1270_v49, %v2457_v12  ;;  %v855_v44 = vrot.slane %v2593_v33, %v2423_v56  ;;  %v859_v50 = vrot.slane %v2593_v33, %v2426_v57  ;;  %v863_v54 = vrot.slane %v2593_v33, %v2431_v59 }
  0xd1   : > { %v1267_v52 = vcombine.low %v1259_v38, %v1266_v40  ;;  %v1299_v53 = vrot.slane %v1271_v47, %v2457_v12  ;;  %v1300_v62 = vcombine.low %v1278_v41, %v1285_v34  ;;  %v867_v1 = vrot.slane %v2593_v33, %v2434_v60 }
  0xd2   : > { %v871_v2 = vrot.slane %v2593_v33, %v2437_v61  ;;  %v875_v3 = vrot.slane %v2593_v33, %v2448_v7  ;;  %v879_v4 = vrot.slane %v2593_v33, %v2454_v11  ;;  %v1513_v8 = vcombine.low %v851_v37, %v855_v44 }
  0xd3   : > { %1866 = vperm.xlu1 %2187, %v1267_v52   ;;  %v1301_v9 = vcombine.low %v1292_v35, %v1299_v53  ;;  %v1308_v10 = vrot.slane %v1300_v62, %v2457_v12  ;;  %v1514_v18 = vcombine.low %v859_v50, %v863_v54  ;;  %v723_v38 = vrot.slane %v2553_v6, %v2420_v55 }
  0xd4   : > { %v1515_v49 = vcombine.low %v867_v1, %v871_v2  ;;  %v1516_v40 = vcombine.low %v875_v3, %v879_v4  ;;  %v1523_v47 = vrot.slane %v1513_v8, %v2457_v12  ;;  %v727_v41 = vrot.slane %v2553_v6, %v2423_v56 }
  0xd5   : > { %v1315_v34 = vrot.slane %v1301_v9, %v2457_v12  ;;  %v1530_v26 = vrot.slane %v1514_v18, %v2457_v12  ;;  %v731_v37 = vrot.slane %v2553_v6, %v2426_v57  ;;  %v735_v35 = vrot.slane %v2553_v6, %v2431_v59 }
  0xd6   : > { %v1537_v44 = vrot.slane %v1515_v49, %v2457_v12  ;;  %v1544_v50 = vrot.slane %v1516_v40, %v2457_v12  ;;  %v739_v54 = vrot.slane %v2553_v6, %v2434_v60  ;;  %v743_v52 = vrot.slane %v2553_v6, %v2437_v61 }
  0xd7   : > { %v1316_v53 = vcombine.low %v1308_v10, %v1315_v34  ;;  %v1545_v62 = vcombine.low %v1523_v47, %v1530_v26  ;;  %v747_v1 = vrot.slane %v2553_v6, %v2448_v7  ;;  %v751_v2 = vrot.slane %v2553_v6, %v2454_v11 }
  0xd8   : > { %v1546_v3 = vcombine.low %v1537_v44, %v1544_v50  ;;  %v1317_v4 = vcombine.low %v723_v38, %v727_v41  ;;  %v1318_v8 = vcombine.low %v731_v37, %v735_v35  ;;  %v1319_v9 = vcombine.low %v739_v54, %v743_v52 }
  0xd9   : > { %1869 = vperm.xlu1 %2187, %v1316_v53   ;;  %v1553_v18 = vrot.slane %v1545_v62, %v2457_v12  ;;  %v1320_v49 = vcombine.low %v747_v1, %v751_v2  ;;  %v915_v40 = vrot.slane %v2613_v0, %v2420_v55  ;;  %v919_v26 = vrot.slane %v2613_v0, %v2423_v56 }
  0xda   : > { %v1560_v10 = vrot.slane %v1546_v3, %v2457_v12  ;;  %v1327_v47 = vrot.slane %v1317_v4, %v2457_v12  ;;  %v1334_v34 = vrot.slane %v1318_v8, %v2457_v12  ;;  %v1341_v38 = vrot.slane %v1319_v9, %v2457_v12 }
  0xdb   : > { %v1348_v41 = vrot.slane %v1320_v49, %v2457_v12  ;;  %v923_v37 = vrot.slane %v2613_v0, %v2426_v57  ;;  %v927_v35 = vrot.slane %v2613_v0, %v2431_v59  ;;  %v931_v44 = vrot.slane %v2613_v0, %v2434_v60 }
  0xdc   : > { %v1561_v50 = vcombine.low %v1553_v18, %v1560_v10  ;;  %v1349_v54 = vcombine.low %v1327_v47, %v1334_v34  ;;  %v935_v52 = vrot.slane %v2613_v0, %v2437_v61  ;;  %v939_v53 = vrot.slane %v2613_v0, %v2448_v7 }
  0xdd   : > { %v1350_v62 = vcombine.low %v1341_v38, %v1348_v41  ;;  %v943_v1 = vrot.slane %v2613_v0, %v2454_v11  ;;  %v1611_v2 = vcombine.low %v915_v40, %v919_v26  ;;  %v1612_v3 = vcombine.low %v923_v37, %v927_v35 }
  0xde   : > { %1884 = vperm.xlu0 %2186, %v1561_v50   ;;  %v1357_v4 = vrot.slane %v1349_v54, %v2457_v12  ;;  %v1613_v8 = vcombine.low %v931_v44, %v935_v52  ;;  %v755_v9 = vrot.slane %v2570_v45, %v2420_v55  ;;  %v759_v18 = vrot.slane %v2570_v45, %v2423_v56 }
  0xdf   : > { %v1364_v49 = vrot.slane %v1350_v62, %v2457_v12  ;;  %v1614_v10 = vcombine.low %v939_v53, %v943_v1  ;;  %v1621_v47 = vrot.slane %v1611_v2, %v2457_v12  ;;  %v1628_v34 = vrot.slane %v1612_v3, %v2457_v12 }
  0xe0   : > { %v1635_v40 = vrot.slane %v1613_v8, %v2457_v12  ;;  %v763_v26 = vrot.slane %v2570_v45, %v2426_v57  ;;  %v767_v38 = vrot.slane %v2570_v45, %v2431_v59  ;;  %v771_v41 = vrot.slane %v2570_v45, %v2434_v60 }
  0xe1   : > { %v1365_v37 = vcombine.low %v1357_v4, %v1364_v49  ;;  %v1642_v35 = vrot.slane %v1614_v10, %v2457_v12  ;;  %v1643_v44 = vcombine.low %v1621_v47, %v1628_v34  ;;  %v775_v50 = vrot.slane %v2570_v45, %v2437_v61 }
  0xe2   : > { %v779_v54 = vrot.slane %v2570_v45, %v2448_v7  ;;  %v783_v52 = vrot.slane %v2570_v45, %v2454_v11  ;;  %v1366_v53 = vcombine.low %v755_v9, %v759_v18  ;;  %v1367_v62 = vcombine.low %v763_v26, %v767_v38 }
  0xe3   : > { %1872 = vperm.xlu1 %2187, %v1365_v37   ;;  %v1644_v1 = vcombine.low %v1635_v40, %v1642_v35  ;;  %v1651_v2 = vrot.slane %v1643_v44, %v2457_v12  ;;  %v1368_v3 = vcombine.low %v771_v41, %v775_v50  ;;  %v979_v4 = vrot.slane %v2634_v36, %v2420_v55 }
  0xe4   : > { %v1369_v8 = vcombine.low %v779_v54, %v783_v52  ;;  %v1376_v49 = vrot.slane %v1366_v53, %v2457_v12  ;;  %v1383_v10 = vrot.slane %v1367_v62, %v2457_v12  ;;  %v983_v47 = vrot.slane %v2634_v36, %v2423_v56 }
  0xe5   : > { %v1658_v34 = vrot.slane %v1644_v1, %v2457_v12  ;;  %v1390_v9 = vrot.slane %v1368_v3, %v2457_v12  ;;  %v987_v18 = vrot.slane %v2634_v36, %v2426_v57  ;;  %v991_v40 = vrot.slane %v2634_v36, %v2431_v59 }
  0xe6   : > { %v1397_v26 = vrot.slane %v1369_v8, %v2457_v12  ;;  %v1398_v38 = vcombine.low %v1376_v49, %v1383_v10  ;;  %v995_v41 = vrot.slane %v2634_v36, %v2434_v60  ;;  %v999_v37 = vrot.slane %v2634_v36, %v2437_v61 }
  0xe7   : > { %v1659_v35 = vcombine.low %v1651_v2, %v1658_v34  ;;  %v1003_v44 = vrot.slane %v2634_v36, %v2448_v7  ;;  %v1007_v50 = vrot.slane %v2634_v36, %v2454_v11  ;;  %v1709_v54 = vcombine.low %v979_v4, %v983_v47 }
  0xe8   : > { %v1399_v52 = vcombine.low %v1390_v9, %v1397_v26  ;;  %v1406_v53 = vrot.slane %v1398_v38, %v2457_v12  ;;  %v1710_v62 = vcombine.low %v987_v18, %v991_v40  ;;  %v1711_v1 = vcombine.low %v995_v41, %v999_v37 }
  0xe9   : > { %1890 = vperm.xlu0 %2186, %v1659_v35   ;;  %v1712_v3 = vcombine.low %v1003_v44, %v1007_v50  ;;  %v1719_v8 = vrot.slane %v1709_v54, %v2457_v12  ;;  %v787_v49 = vrot.slane %v2573_v46, %v2420_v55  ;;  %v791_v2 = vrot.slane %v2573_v46, %v2423_v56 }
  0xea   : > { %v1413_v10 = vrot.slane %v1399_v52, %v2457_v12  ;;  %v1726_v34 = vrot.slane %v1710_v62, %v2457_v12  ;;  %v1733_v4 = vrot.slane %v1711_v1, %v2457_v12  ;;  %v795_v47 = vrot.slane %v2573_v46, %v2426_v57 }
  0xeb   : > { %v1740_v9 = vrot.slane %v1712_v3, %v2457_v12  ;;  %v799_v18 = vrot.slane %v2573_v46, %v2431_v59  ;;  %v803_v40 = vrot.slane %v2573_v46, %v2434_v60  ;;  %v807_v26 = vrot.slane %v2573_v46, %v2437_v61 }
  0xec   : > { %v1414_v38 = vcombine.low %v1406_v53, %v1413_v10  ;;  %v1741_v41 = vcombine.low %v1719_v8, %v1726_v34  ;;  %v811_v37 = vrot.slane %v2573_v46, %v2448_v7  ;;  %v815_v35 = vrot.slane %v2573_v46, %v2454_v11 }
  0xed   : > { %v1742_v44 = vcombine.low %v1733_v4, %v1740_v9  ;;  %v1415_v50 = vcombine.low %v787_v49, %v791_v2  ;;  %v1416_v54 = vcombine.low %v795_v47, %v799_v18  ;;  %v1417_v52 = vcombine.low %v803_v40, %v807_v26 }
  0xee   : > { %1875 = vperm.xlu1 %2187, %v1414_v38   ;;  %v1749_v62 = vrot.slane %v1741_v41, %v2457_v12  ;;  %v1418_v1 = vcombine.low %v811_v37, %v815_v35  ;;  %v1043_v3 = vrot.slane %v2656_v48, %v2420_v55  ;;  %v1047_v53 = vrot.slane %v2656_v48, %v2423_v56 }
  0xef   : > { %v1756_v8 = vrot.slane %v1742_v44, %v2457_v12  ;;  %v1425_v10 = vrot.slane %v1415_v50, %v2457_v12  ;;  %v1432_v34 = vrot.slane %v1416_v54, %v2457_v12  ;;  %v1439_v49 = vrot.slane %v1417_v52, %v2457_v12 }
  0xf0   : > { %v1446_v2 = vrot.slane %v1418_v1, %v2457_v12  ;;  %v1051_v4 = vrot.slane %v2656_v48, %v2426_v57  ;;  %v1055_v47 = vrot.slane %v2656_v48, %v2431_v59  ;;  %v1059_v9 = vrot.slane %v2656_v48, %v2434_v60 }
  0xf1   : > { %v1757_v18 = vcombine.low %v1749_v62, %v1756_v8  ;;  %v1447_v40 = vcombine.low %v1425_v10, %v1432_v34  ;;  %v1063_v26 = vrot.slane %v2656_v48, %v2437_v61  ;;  %v1067_v38 = vrot.slane %v2656_v48, %v2448_v7 }
  0xf2   : > { %v1448_v41 = vcombine.low %v1439_v49, %v1446_v2  ;;  %v1071_v37 = vrot.slane %v2656_v48, %v2454_v11  ;;  %v1807_v35 = vcombine.low %v1043_v3, %v1047_v53  ;;  %v1808_v44 = vcombine.low %v1051_v4, %v1055_v47 }
  0xf3   : > { %1896 = vperm.xlu0 %2186, %v1757_v18   ;;  %v1455_v50 = vrot.slane %v1447_v40, %v2457_v12  ;;  %v1809_v54 = vcombine.low %v1059_v9, %v1063_v26  ;;  %v819_v52 = vrot.slane %v2590_v32, %v2420_v55  ;;  %v823_v62 = vrot.slane %v2590_v32, %v2423_v56 }
  0xf4   : > { %v1462_v1 = vrot.slane %v1448_v41, %v2457_v12  ;;  %v1810_v8 = vcombine.low %v1067_v38, %v1071_v37  ;;  %v1817_v10 = vrot.slane %v1807_v35, %v2457_v12  ;;  %v1824_v34 = vrot.slane %v1808_v44, %v2457_v12 }
  0xf5   : > { %v1831_v3 = vrot.slane %v1809_v54, %v2457_v12  ;;  %v827_v53 = vrot.slane %v2590_v32, %v2426_v57  ;;  %v831_v49 = vrot.slane %v2590_v32, %v2431_v59  ;;  %v835_v2 = vrot.slane %v2590_v32, %v2434_v60 }
  0xf6   : > { %v1463_v4 = vcombine.low %v1455_v50, %v1462_v1  ;;  %v1838_v47 = vrot.slane %v1810_v8, %v2457_v12  ;;  %v1839_v9 = vcombine.low %v1817_v10, %v1824_v34  ;;  %v839_v18 = vrot.slane %v2590_v32, %v2437_v61 }
  0xf7   : > { %v843_v40 = vrot.slane %v2590_v32, %v2448_v7  ;;  %v847_v26 = vrot.slane %v2590_v32, %v2454_v11  ;;  %v1464_v38 = vcombine.low %v819_v52, %v823_v62  ;;  %v1465_v41 = vcombine.low %v827_v53, %v831_v49 }
  0xf8   : > { %1878 = vperm.xlu1 %2187, %v1463_v4   ;;  %v1840_v37 = vcombine.low %v1831_v3, %v1838_v47  ;;  %v1847_v35 = vrot.slane %v1839_v9, %v2457_v12  ;;  %v1466_v44 = vcombine.low %v835_v2, %v839_v18  ;;  %v883_v50 = vrot.slane %v2610_v63, %v2420_v55 }
  0xf9   : > { %v1467_v54 = vcombine.low %v843_v40, %v847_v26  ;;  %v1474_v1 = vrot.slane %v1464_v38, %v2457_v12  ;;  %v1481_v8 = vrot.slane %v1465_v41, %v2457_v12  ;;  %v887_v10 = vrot.slane %v2610_v63, %v2423_v56 }
  0xfa   : > { %v1854_v34 = vrot.slane %v1840_v37, %v2457_v12  ;;  %v1488_v52 = vrot.slane %v1466_v44, %v2457_v12  ;;  %v891_v62 = vrot.slane %v2610_v63, %v2426_v57  ;;  %v895_v3 = vrot.slane %v2610_v63, %v2431_v59 }
  0xfb   : > { %v1495_v53 = vrot.slane %v1467_v54, %v2457_v12  ;;  %v1496_v49 = vcombine.low %v1474_v1, %v1481_v8  ;;  %v899_v2 = vrot.slane %v2610_v63, %v2434_v60  ;;  %v903_v4 = vrot.slane %v2610_v63, %v2437_v61 }
  0xfc   : > { %v1855_v47 = vcombine.low %v1847_v35, %v1854_v34  ;;  %v907_v9 = vrot.slane %v2610_v63, %v2448_v7  ;;  %v911_v18 = vrot.slane %v2610_v63, %v2454_v11  ;;  %v1562_v40 = vcombine.low %v883_v50, %v887_v10 }
  0xfd   : > { %v1497_v26 = vcombine.low %v1488_v52, %v1495_v53  ;;  %v1504_v38 = vrot.slane %v1496_v49, %v2457_v12  ;;  %v1563_v41 = vcombine.low %v891_v62, %v895_v3  ;;  %v1564_v37 = vcombine.low %v899_v2, %v903_v4 }
  0xfe   : > { %1902 = vperm.xlu0 %2186, %v1855_v47   ;;  %v1565_v44 = vcombine.low %v907_v9, %v911_v18  ;;  %v1572_v54 = vrot.slane %v1562_v40, %v2457_v12  ;;  %v947_v1 = vrot.slane %v2631_v19, %v2420_v55  ;;  %v951_v35 = vrot.slane %v2631_v19, %v2423_v56 }
  0xff   : > { %v1511_v8 = vrot.slane %v1497_v26, %v2457_v12  ;;  %v1579_v34 = vrot.slane %v1563_v41, %v2457_v12  ;;  %v1586_v50 = vrot.slane %v1564_v37, %v2457_v12  ;;  %v955_v10 = vrot.slane %v2631_v19, %v2426_v57 }
 0x100   : > { %v1593_v52 = vrot.slane %v1565_v44, %v2457_v12  ;;  %v959_v62 = vrot.slane %v2631_v19, %v2431_v59  ;;  %v963_v3 = vrot.slane %v2631_v19, %v2434_v60  ;;  %v967_v53 = vrot.slane %v2631_v19, %v2437_v61 }
 0x101   : > { %v1512_v49 = vcombine.low %v1504_v38, %v1511_v8  ;;  %v1594_v2 = vcombine.low %v1572_v54, %v1579_v34  ;;  %v971_v4 = vrot.slane %v2631_v19, %v2448_v7  ;;  %v975_v47 = vrot.slane %v2631_v19, %v2454_v11 }
 0x102   : > { %v1595_v9 = vcombine.low %v1586_v50, %v1593_v52  ;;  %v1660_v18 = vcombine.low %v947_v1, %v951_v35  ;;  %v1661_v40 = vcombine.low %v955_v10, %v959_v62  ;;  %v1662_v26 = vcombine.low %v963_v3, %v967_v53 }
 0x103   : > { %1881 = vperm.xlu1 %2187, %v1512_v49   ;;  %v1602_v41 = vrot.slane %v1594_v2, %v2457_v12  ;;  %v1663_v37 = vcombine.low %v971_v4, %v975_v47  ;;  %v1011_v44 = vrot.slane %v2653_v39, %v2420_v55  ;;  %v1015_v38 = vrot.slane %v2653_v39, %v2423_v56 }
 0x104   : > { %v1609_v54 = vrot.slane %v1595_v9, %v2457_v12  ;;  %v1670_v8 = vrot.slane %v1660_v18, %v2457_v12  ;;  %v1677_v34 = vrot.slane %v1661_v40, %v2457_v12  ;;  %v1684_v1 = vrot.slane %v1662_v26, %v2457_v12 }
 0x105   : > { %v1691_v35 = vrot.slane %v1663_v37, %v2457_v12  ;;  %v1019_v50 = vrot.slane %v2653_v39, %v2426_v57  ;;  %v1023_v55 = vrot.slane %v2653_v39, %v2431_v59  ;;  %v1027_v56 = vrot.slane %v2653_v39, %v2434_v60 }
 0x106   : > { %v1610_v10 = vcombine.low %v1602_v41, %v1609_v54  ;;  %v1692_v52 = vcombine.low %v1670_v8, %v1677_v34  ;;  %v1031_v62 = vrot.slane %v2653_v39, %v2437_v61  ;;  %v1035_v3 = vrot.slane %v2653_v39, %v2448_v7 }
 0x107   : > { %v1693_v53 = vcombine.low %v1684_v1, %v1691_v35  ;;  %v1039_v49 = vrot.slane %v2653_v39, %v2454_v11  ;;  %v1758_v57 = vcombine.low %v1011_v44, %v1015_v38  ;;  %v1759_v2 = vcombine.low %v1019_v50, %v1023_v55 }
 0x108   : > { %1887 = vperm.xlu1 %2187, %v1610_v10   ;;  %v1700_v59 = vrot.slane %v1692_v52, %v2457_v12  ;;  %v1760_v60 = vcombine.low %v1027_v56, %v1031_v62  ;;  %vm376_vm5 = vcmp.gt.f32.partialorder %v2488_v24, 0.0  ;;  %vm377_vm6 = vcmp.gt.f32.partialorder %v2528_v42, 0.0 }
 0x109   : > { %v1707_v61 = vrot.slane %v1693_v53, %v2457_v12  ;;  %v1761_v4 = vcombine.low %v1035_v3, %v1039_v49  ;;  %v1768_v7 = vrot.slane %v1758_v57, %v2457_v12  ;;  %v1775_v47 = vrot.slane %v1759_v2, %v2457_v12 }
 0x10a   : > { %v1782_v11 = vrot.slane %v1760_v60, %v2457_v12  ;;  %v2286_v9 = vmov -1.0   ;;  %vm378_vm7 = vcmp.gt.f32.partialorder %v2500_v28, 0.0  ;;  %vm379_vm10 = vcmp.gt.f32.partialorder %v2531_v43, 0.0 }
 0x10b   : > { %v392_v18 = vsel %vm376_vm5, 1.0, %v2286_v9  ;;  %v393_v40 = vsel %vm377_vm6, 1.0, %v2286_v9  ;;  %v1708_v24 = vcombine.low %v1700_v59, %v1707_v61  ;;  %v1789_v42 = vrot.slane %v1761_v4, %v2457_v12 }
 0x10c   : > { %v1790_v26 = vcombine.low %v1768_v7, %v1775_v47  ;;  %v429_v41 = vrot.slane %v392_v18, %v2461_v13  ;;  %v434_v37 = vrot.slane %v393_v40, %v2464_v14  ;;  %v394_v44 = vsel %vm378_vm7, 1.0, %v2286_v9  ;;  %v3118_v47 = vld [vmem:[#allocation9_spill] sm:$0xff] }
 0x10d   : > { %vm380_vm11 = vcmp.gt.f32.partialorder %v2550_v5, 0.0  ;;  %1893 = vperm.xlu1 %2187, %v1708_v24   ;;  %v1791_v38 = vcombine.low %v1782_v11, %v1789_v42  ;;  %v441_v54 = vrot.slane %v394_v44, %v2467_v15  ;;  %v395_v8 = vsel %vm379_vm10, 1.0, %v2286_v9 }
 0x10e   : > { %v1798_v28 = vrot.slane %v1790_v26, %v2457_v12  ;;  %v436_v34 = vsel %vm435_vm1, %v434_v37, %v429_v41  ;;  %v448_v1 = vrot.slane %v395_v8, %v2470_v16  ;;  %v396_v35 = vsel %vm380_vm11, 1.0, %v2286_v9 }
 0x10f   : > { %vm385_vm13 = vcmp.gt.f32.partialorder %v2593_v33, 0.0  ;;  %v1805_v43 = vrot.slane %v1791_v38, %v2457_v12  ;;  %v443_v5 = vsel %vm442_vm2, %v441_v54, %v436_v34  ;;  %v455_v50 = vrot.slane %v396_v35, %v2473_v17 }
 0x110   : > { %v528_v55 = vadd.s32 4294967176, %v2428_v58  ;;  %v450_v56 = vsel %vm449_vm3, %v448_v1, %v443_v5  ;;  %v401_v10 = vsel %vm385_vm13, 1.0, %v2286_v9  ;;  %vm381_vm0 = vcmp.gt.f32.partialorder %v2553_v6, 0.0 }
 0x111   : > { %vm498_vm5 = vcmask 720512   ;;  %v2929_v33 = vsub.s32 %v2506_v30, %v2415_v51  ;;  %v1806_v52 = vcombine.low %v1798_v28, %v1805_v43  ;;  %v397_v62 = vsel %vm381_vm0, 1.0, %v2286_v9 }
 0x112   : > { %vm387_vm6 = vcmp.gt.f32.partialorder %v2613_v0, 0.0  ;;  %v2935_v3 = vsub.s32 %v2503_v29, %v2415_v51  ;;  %vm505_vm7 = vcmask 786112   ;;  %v457_v53 = vsel %vm3114_vm4, %v455_v50, %v450_v56 }
 0x113   : > { %v462_v49 = vrot.slane %v397_v62, %v2476_v20  ;;  %vm382_vm10 = vcmp.gt.f32.partialorder %v2570_v45, 0.0  ;;  %v2942_v30 = vsub.s32 %v2509_v31, %v2415_v51  ;;  %1899 = vperm.xlu1 %2187, %v1806_v52   ;;  %v490_v6 = vrot.slane %v401_v10, %v2491_v25 }
 0x114   : > { %v398_v0 = vsel %vm382_vm10, 1.0, %v2286_v9  ;;  %vm383_vm11 = vcmp.gt.f32.partialorder %v2573_v46, 0.0  ;;  %v2948_v29 = vsub.s32 %v528_v55, %v2415_v51  ;;  %v403_v57 = vsel %vm387_vm6, 1.0, %v2286_v9 }
 0x115   : > { %v469_v2 = vrot.slane %v398_v0, %v2479_v21  ;;  %vm389_vm13 = vcmp.gt.f32.partialorder %v2634_v36, 0.0  ;;  %v399_v45 = vsel %vm383_vm11, 1.0, %v2286_v9  ;;  %v464_v31 = vsel %vm463_vm8, %v462_v49, %v457_v53 }
 0x116   : > { %v476_v59 = vrot.slane %v399_v45, %v2482_v22  ;;  %vm384_vm0 = vcmp.gt.f32.partialorder %v2590_v32, 0.0  ;;  %vm386_vm10 = vcmp.gt.f32.partialorder %v2610_v63, 0.0  ;;  %vm391_vm4 = vcmp.gt.f32.partialorder %v2656_v48, 0.0 }
 0x117   : > { %v471_v46 = vsel %vm470_vm9, %v469_v2, %v464_v31  ;;  %v400_v60 = vsel %vm384_vm0, 1.0, %v2286_v9  ;;  %v402_v61 = vsel %vm386_vm10, 1.0, %v2286_v9  ;;  %v405_v36 = vsel %vm389_vm13, 1.0, %v2286_v9 }
 0x118   : > { %v483_v4 = vrot.slane %v400_v60, %v2485_v23  ;;  %v497_v7 = vrot.slane %v402_v61, %v2497_v27  ;;  %vm388_vm6 = vcmp.gt.f32.partialorder %v2631_v19, 0.0  ;;  %v504_v32 = vrot.slane %v403_v57, %v3118_v47 }
 0x119   : > { %v478_v63 = vsel %vm477_vm12, %v476_v59, %v471_v46  ;;  %v404_v11 = vsel %vm388_vm6, 1.0, %v2286_v9  ;;  %vm390_vm11 = vcmp.gt.f32.partialorder %v2653_v39, 0.0  ;;  %v407_v48 = vsel %vm391_vm4, 1.0, %v2286_v9 }
 0x11a   : > { %v485_v18 = vsel %vm484_vm14, %v483_v4, %v478_v63  ;;  %v511_v40 = vrot.slane %v404_v11, %v2929_v33  ;;  %v406_v24 = vsel %vm390_vm11, 1.0, %v2286_v9  ;;  %v518_v19 = vrot.slane %v405_v36, %v2935_v3 }
 0x11b   : > { %v492_v42 = vsel %vm491_vm15, %v490_v6, %v485_v18  ;;  %vm512_vm13 = vcmask 851712   ;;  %vm519_vm0 = vcmask 917312   ;;  %v525_v39 = vrot.slane %v406_v24, %v2942_v30 }
 0x11c   : > { %v499_v26 = vsel %vm498_vm5, %v497_v7, %v492_v42  ;;  %v532_v41 = vrot.slane %v407_v48, %v2948_v29  ;;  %vm526_vm4 = vcmask 982912   ;;  %vm533_vm10 = vcmask 1048512  }
 0x11d   : > { %v506_v37 = vsel %vm505_vm7, %v504_v32, %v499_v26 }
 0x11e   : > { %v513_v9 = vsel %vm512_vm13, %v511_v40, %v506_v37 }
 0x11f   : > { %v520_v44 = vsel %vm519_vm0, %v518_v19, %v513_v9 }
 0x120   : > { %v527_v38 = vsel %vm526_vm4, %v525_v39, %v520_v44 }
 0x121   : > { %v534_v28 = vsel %vm533_vm10, %v532_v41, %v527_v38 }
 0x122   : > { %536 = vst [vmem:[%s245_s16] sm:$0x1] %v534_v28 }
 0x123   : > { %2201 = shalt.err (!%p2198_p3)
}
 0x124   : > { %s2202_s10 = scalar_lea.hbm %s2991_s24, 16  ;;  %s2206_s13 = scalar_lea.hbm %s3111_s4, 48 }
 0x125   : > { %p2203_p4 = scmp.ne.s32.totalorder %s2991_s24, %s2202_s10  ;;  %p2207_p9 = scmp.lt.u32.totalorder %s2991_s24, %s3111_s4 }
 0x126   : > { %p2208_p10 = scmp.lt.u32.totalorder %s2206_s13, %s2202_s10  ;;  %p2210_p12 = scmp.lt.u32.totalorder %s2202_s10, %s2991_s24 }
 0x127   : > { %p2204_p7 = pnand %p2203_p4, %p2360_p5 }
 0x128   : > { %p2209_p11 = por %p2208_p10, %p2207_p9 }
 0x129   : > { %p2205_p8 = pneg %p2204_p7 }
 0x12a   : > { %p2211_p13 = por %p2210_p12, %p2209_p11 }
 0x12c   : > { %p2212_p0 = pnand %p2211_p13, %p2205_p8 }
 0x12e   : > { %2215 = shalt.err (!%p2212_p0)
}
 0x12f   : > { %2139 = dma.vmem_to_hbm [thread:$0]  (%p2360_p5), %s2993_s17, 16, %s2991_s24, %s2006_s26   ;;  %v540_v48 = vmul.u32 128, %v2415_v51 }
 0x130   : > { %p266_p1 = scmp.lt.s32.totalorder %s2343_s0, 2  ;;  %s2134_s17 = sshll.u32 %s2343_s0, 7 }
 0x131   : > { %v541_v40 = vstv %s2134_s17  ;;  %s251_s26 = scalar_lea.vmem [#allocation5], %s2971_s15  ;;  %s3064_s8 = scalar_lea.hbm %s3112_s5, %s2371_s6 }
 0x132   : > { %s3125_s0 = smov (!%p266_p1, %s2343_s0), 2  ;;  %v542_v19 = vadd.s32 %v541_v40, %v540_v48  ;;  %s2035_s27 = sshll.u32 %s251_s26, 4  ;;  %s3066_s27 = int_to_ptr.vmem [resolvable:$true] %s2035_s27 }
 0x133   : > { %s268_s24 = scalar_lea.vmem %s3110_s3, %s3125_s0  ;;  %s2010_s9 = scalar_lea.sflag [#allocation6], %s2971_s15 }
 0x134   : > { %v287_v42 = vld [vmem:[%s268_s24] sm:$0x1]  ;;  %s2216_s10 = scalar_lea.vmem %s3066_s27, 16  ;;  %s2288_s11 = smov [#allocation5]  }
 0x135   : > { %p2217_p2 = scmp.ne.s32.totalorder %s3066_s27, %s2216_s10  ;;  %s2220_s12 = sshll.u32 %s2288_s11, 4  ;;  %s2221_s12 = int_to_ptr.vmem [resolvable:$false] %s2220_s12 }
 0x136   : > { %s2222_s13 = scalar_lea.vmem %s2221_s12, 32  ;;  %p2223_p7 = scmp.lt.s32.totalorder %s3066_s27, %s2221_s12 }
 0x137   : > { %p2218_p3 = pnand %p2217_p2, %p2360_p5  ;;  %p2224_p8 = scmp.lt.s32.totalorder %s2222_s13, %s2216_s10 }
 0x139   : > { %p2219_p4 = pneg %p2218_p3  ;;  %p2225_p9 = por %p2224_p8, %p2223_p7 }
 0x13b   : > { %p2226_p10 = pnand %p2225_p9, %p2219_p4 }
 0x140   : > { %v1858_v54 = vpop.permute.xlu0 %1857 }
 0x141   : > { %v1907_v34 = vrot.slane %v1858_v54, %v2461_v13 }
 0x146   : > { %v1861_v8 = vpop.permute.xlu1 %1860 }
 0x147   : > { %v1911_v1 = vrot.slane %v1861_v8, %v2464_v14 }
 0x149   : > { %v1912_v35 = vsel %vm435_vm1, %v1911_v1, %v1907_v34  ;;  %vm3119_vm1 = vcmask 326912  }
 0x14c   : > { %v1864_v43 = vpop.permute.xlu1 %1863 }
 0x14d   : > { %v1916_v5 = vrot.slane %v1864_v43, %v2467_v15 }
 0x14f   : > { %v1917_v50 = vsel %vm442_vm2, %v1916_v5, %v1912_v35 }
 0x152   : > { %v1867_v55 = vpop.permute.xlu1 %1866 }
 0x153   : > { %v1921_v49 = vrot.slane %v1867_v55, %v2470_v16 }
 0x155   : > { %v1922_v57 = vsel %vm449_vm3, %v1921_v49, %v1917_v50 }
 0x158   : > { %v1870_v56 = vpop.permute.xlu1 %1869 }
 0x159   : > { %v1926_v6 = vrot.slane %v1870_v56, %v2473_v17 }
 0x15b   : > { %v1927_v2 = vsel %vm3119_vm1, %v1926_v6, %v1922_v57 }
 0x15d   : > { %v1885_v53 = vpop.permute.xlu0 %1884 }
 0x162   : > { %v1873_v10 = vpop.permute.xlu1 %1872 }
 0x163   : > { %v1931_v13 = vrot.slane %v1873_v10, %v2476_v20 }
 0x165   : > { %v1932_v16 = vsel %vm463_vm8, %v1931_v13, %v1927_v2 }
 0x168   : > { %v1891_v45 = vpop.permute.xlu0 %1890 }
 0x169   : > { %v1961_v7 = vrot.slane %v1891_v45, %v3118_v47 }
 0x16d   : > { %v1876_v52 = vpop.permute.xlu1 %1875 }
 0x16e   : > { %v1936_v0 = vrot.slane %v1876_v52, %v2479_v21 }
 0x170   : > { %v1937_v17 = vsel %vm470_vm9, %v1936_v0, %v1932_v16 }
 0x172   : > { %v1897_v60 = vpop.permute.xlu0 %1896 }
 0x177   : > { %v1879_v62 = vpop.permute.xlu1 %1878 }
 0x178   : > { %v1941_v15 = vrot.slane %v1879_v62, %v2482_v22  ;;  %v1951_v22 = vrot.slane %v1885_v53, %v2491_v25  ;;  %v1971_v25 = vrot.slane %v1897_v60, %v2935_v3 }
 0x17a   : > { %v1942_v20 = vsel %vm477_vm12, %v1941_v15, %v1937_v17 }
 0x17d   : > { %v1903_v63 = vpop.permute.xlu0 %1902 }
 0x182   : > { %v1882_v14 = vpop.permute.xlu1 %1881 }
 0x183   : > { %v1946_v31 = vrot.slane %v1882_v14, %v2485_v23 }
 0x185   : > { %v1947_v21 = vsel %vm484_vm14, %v1946_v31, %v1942_v20 }
 0x186   : > { %v1952_v61 = vsel %vm491_vm15, %v1951_v22, %v1947_v21 }
 0x187   : > { %v1888_v59 = vpop.permute.xlu1 %1887 }
 0x188   : > { %v1956_v46 = vrot.slane %v1888_v59, %v2497_v27 }
 0x18a   : > { %v1957_v23 = vsel %vm498_vm5, %v1956_v46, %v1952_v61 }
 0x18b   : > { %v1962_v32 = vsel %vm505_vm7, %v1961_v7, %v1957_v23 }
 0x18c   : > { %v1894_v36 = vpop.permute.xlu1 %1893 }
 0x18d   : > { %v1966_v4 = vrot.slane %v1894_v36, %v2929_v33  ;;  %v1981_v33 = vrot.slane %v1903_v63, %v2948_v29  ;;  %v543_v29 = vadd.s32 %v542_v19, %v2428_v58 }
 0x18f   : > { %v1967_v11 = vsel %vm512_vm13, %v1966_v4, %v1962_v32  ;;  %vm2001_vm2 = vcmp.lt.s32.totalorder %v543_v29, 300 }
 0x190   : > { %v1972_v47 = vsel %vm519_vm0, %v1971_v25, %v1967_v11 }
 0x192   : > { %v1900_v27 = vpop.permute.xlu1 %1899 }
 0x193   : > { %v1976_v18 = vrot.slane %v1900_v27, %v2942_v30 }
 0x195   : > { %v1977_v24 = vsel %vm526_vm4, %v1976_v18, %v1972_v47 }
 0x196   : > { %v1982_v3 = vsel %vm533_vm10, %v1981_v33, %v1977_v24 }
 0x197   : > { %v1989_v51 = vrot.slane %v1982_v3, %v2457_v12 }
 0x199   : > { %v1996_v30 = vrot.slane %v1989_v51, %v2457_v12 }
 0x19b   : > { %v1998_v26 = vmul.f32 %v1996_v30, %v287_v42 }
 0x19d   : > { %v1999_v39 = vsub.f32 1.0, %v1998_v26 }
 0x19f   : > { %v2000_v41 = vmax.f32 %v1999_v39, 0.0 }
 0x1a1   : > { %v2002_v37 = vsel %vm2001_vm2, %v2000_v41, 0.0 }
 0x1a2   : > { %2004 = vst [vmem:[%s251_s26] sm:$0x1] %v2002_v37 }
 0x1a3   : > { %2229 = shalt.err (!%p2226_p10)
}
 0x1a4   : > { %s2230_s6 = scalar_lea.hbm %s3064_s8, 16  ;;  %s2234_s16 = scalar_lea.hbm %s3112_s5, 48 }
 0x1a5   : > { %p2231_p11 = scmp.ne.s32.totalorder %s3064_s8, %s2230_s6  ;;  %p2235_p0 = scmp.lt.u32.totalorder %s3064_s8, %s3112_s5 }
 0x1a6   : > { %p2236_p1 = scmp.lt.u32.totalorder %s2234_s16, %s2230_s6  ;;  %p2238_p3 = scmp.lt.u32.totalorder %s2230_s6, %s3064_s8 }
 0x1a7   : > { %p2232_p12 = pnand %p2231_p11, %p2360_p5 }
 0x1a8   : > { %p2237_p2 = por %p2236_p1, %p2235_p0 }
 0x1a9   : > { %p2233_p13 = pneg %p2232_p12 }
 0x1aa   : > { %p2239_p4 = por %p2238_p3, %p2237_p2 }
 0x1ac   : > { %p2240_p7 = pnand %p2239_p4, %p2233_p13 }
 0x1ae   : > { %2243 = shalt.err (!%p2240_p7)
}
 0x1af   : > { %2140 = dma.vmem_to_hbm [thread:$0]  (%p2360_p5), %s3066_s27, 16, %s3064_s8, %s2010_s9  }
 0x1b0 PF: > { %p2150_p8 = scmp.ge.s32.totalorder %s2282_s23, 2  ;;  %s2047_s19 = sand.u32 1, %s2270_s20  }
 0x1b1   : > { %s2048_s24 = scalar_lea.sflag [#allocation4], %s2047_s19 }
 0x1b2   : > { %p2144_p9 = pnand %p2150_p8, %p2364_p6 }
 0x1b4   : > { %2261 = dma.done.wait (!%p2144_p9), %s2048_s24, 16  }
 0x1b5   : > { %2263 = vsyncadd (!%p2144_p9), %s2048_s24, 4294967280  ;;  %s2056_s26 = scalar_lea.sflag [#allocation6], %s2047_s19 }
 0x1b6   : > { %2265 = dma.done.wait (!%p2144_p9), %s2056_s26, 16  }
 0x1b7   : > { %2267 = vsyncadd (!%p2144_p9), %s2056_s26, 4294967280  ;;  %p20_p5 = scmp.ge.s32.totalorder %s2347_s25, 5   ;;  %s3120_s20 = smov %s2274_s21 }
 0x1b8   : > { %s3121_s21 = smov %s2278_s22  ;;  %s3122_s22 = smov %s2358_s28 }
 0x1b9   : > { %s3123_s23 = smov %s2347_s25  ;;  %22 = sbr.rel (!%p20_p5) target bundleno = 7 (0x7), region = 91 }
 0x1c0   :  { %2060 = vsyncpa [#allocation4], 1 }
 0x1c1   :  { %2062 = vsyncpa [#allocation4 + $0x1], 1 }
 0x1c2   :  { %2063 = vsyncpa [#allocation6], 1 }
 0x1c3   :  { %2065 = vsyncpa [#allocation6 + $0x1], 1 }

</bundles_post_ra>
